<compile_context>
chip_gen: v7x
topology: tpu7x:2x2x1
jax: 0.10.0
libtpu: 0.0.40
codegen_flags: <defaults>
</compile_context>

<pallas_src>
import functools

import jax
import jax.numpy as jnp
from jax.experimental import pallas as pl
from jax.experimental.pallas import tpu as pltpu


def _round_up(x: int, m: int) -> int:
    return ((x + m - 1) // m) * m


def _span_conv_kernel(cur_ref, look_ref, w_ref, b_ref, o_ref, *,
                      max_width: int, span_mode: str, tl: int, d: int):
    """One (batch, L-tile) grid step.

    cur_ref:  (1, tl, Dp)           current tile of x
    look_ref: (1, LK, Dp)           lookahead rows (start of the next tile)
    w_ref:    (Dp, Dp)              projection weight (pre-cast, applied as rep @ W)
    b_ref:    (1, Dp)               projection bias (f32)
    o_ref:    (1, tl, W*Dp)         lane-dense flattened output
    """
    is_last = pl.program_id(1) == pl.num_programs(1) - 1

    cur = cur_ref[0]                                    # (tl, Dp), input dtype
    look = look_ref[0]                                  # (LK, Dp)
    # On the last L-tile the clamped lookahead block aliases real data; zero it
    # so it acts as the convolution's right zero-padding.
    look = jnp.where(is_last, jnp.zeros_like(look), look)

    # Pooling accumulator dtype: max is exact in the input dtype; sum/mean keep
    # an f32 accumulator to avoid bf16 rounding for larger W.
    if span_mode == "conv_max":
        cur_p, look_p = cur, look
    else:
        cur_p, look_p = cur.astype(jnp.float32), look.astype(jnp.float32)

    w = w_ref[...]                                      # hoisted, MXU-native dtype
    bias = jnp.broadcast_to(b_ref[...].astype(jnp.float32), (tl, d))  # bound once

    buf = jnp.concatenate([cur_p, look_p], axis=0)      # (tl + LK, Dp) sliding buf

    def project_and_store(rep, slab):
        lhs = rep if rep.dtype == w.dtype else rep.astype(w.dtype)
        y = jnp.dot(lhs, w, preferred_element_type=jnp.float32) + bias
        y = jnp.maximum(y, 0.0)
        # slab*d is a multiple of 128 -> unmasked lane-aligned store.
        o_ref[0, :, slab * d:(slab + 1) * d] = y.astype(o_ref.dtype)

    # Width-1 span rep is x itself.
    acc = cur_p
    project_and_store(acc, 0)

    # Widths 2..max_width via a running window op over row-shifted views.
    for k in range(2, max_width + 1):
        shifted = buf[k - 1:k - 1 + tl]                 # row l+k-1 for local row l
        if span_mode == "conv_max":
            acc = jnp.maximum(acc, shifted)
            rep = acc
        elif span_mode == "conv_sum":
            acc = acc + shifted
            rep = acc
        else:  # conv_mean (count_include_pad=True -> divide by k)
            acc = acc + shifted
            rep = acc * (1.0 / k)
        project_and_store(rep, k - 1)


def span_conv(x, proj_w, proj_b, *, max_width, span_mode="conv_max",
              tile_l=None):
    """Pallas implementation of SpanConv.forward for the pooling span modes."""
    if span_mode == "conv_conv":
        # TODO(synk): 'conv_conv' (learned nn.Conv1d per width) needs per-width
        # weight tensors; only the pooling span modes are implemented here.
        raise NotImplementedError("span_mode='conv_conv' is not supported")
    assert span_mode in ("conv_max", "conv_mean", "conv_sum")

    B, L, D = x.shape
    W = max_width
    itemsize = jnp.dtype(x.dtype).itemsize
    sub = 8 if itemsize >= 4 else (16 if itemsize == 2 else 32)

    # Lane-align the feature dim so per-slab stores are unmasked and the MXU
    # uses full lanes (no-op when D % 128 == 0).
    Dp = _round_up(D, 128)

    # Lookahead rows needed per tile: W-1, rounded to a sublane multiple.
    LK = _round_up(max(W - 1, 1), sub)

    if tile_l is None:
        tile_l = 512                       # HBM-roofline-friendly default
    tl = min(tile_l, _round_up(L, sub))
    tl = _round_up(max(tl, LK), LK)        # tl >= LK and tl % LK == 0

    def vmem_estimate(t):
        # double-buffered blocks + in-kernel f32 temporaries (rough).
        in_b = 2 * t * Dp * itemsize + 2 * LK * Dp * itemsize
        w_b = 2 * (Dp * Dp + Dp) * itemsize
        out_b = 2 * t * W * Dp * itemsize
        tmp_b = 6 * t * Dp * 4
        return in_b + w_b + out_b + tmp_b

    VMEM_BUDGET = 32 * 1024 * 1024         # keeps v7x's 64 MiB physical safe
    while vmem_estimate(tl) > VMEM_BUDGET and tl > LK:
        tl = max(LK, _round_up(tl // 2, LK))

    num_tiles = pl.cdiv(L, tl)
    l_pad = num_tiles * tl

    # Only pad when the shape actually requires it (no extra lookahead tile).
    pad_l = l_pad - L
    pad_d = Dp - D
    x_in = x if (pad_l == 0 and pad_d == 0) else jnp.pad(
        x, ((0, 0), (0, pad_l), (0, pad_d)))
    w_in = proj_w if pad_d == 0 else jnp.pad(proj_w, ((0, pad_d), (0, pad_d)))
    b_in = proj_b if pad_d == 0 else jnp.pad(proj_b, ((0, pad_d),))
    w_in = w_in.astype(x.dtype)                    # MXU-native operand dtype
    b_in = b_in.astype(jnp.float32).reshape(1, Dp)

    blocks_per_tile = tl // LK
    last_lk_block = l_pad // LK - 1

    def look_map(b, t):
        # Lookahead = first LK rows of tile t+1; clamp for the last tile (the
        # kernel zeroes those rows under is_last).
        return (b, jnp.minimum((t + 1) * blocks_per_tile, last_lk_block), 0)

    flops = 2 * B * l_pad * W * Dp * Dp
    bytes_accessed = (B * l_pad * Dp * itemsize               # x read
                      + B * num_tiles * LK * Dp * itemsize    # lookahead re-read
                      + B * l_pad * W * Dp * itemsize         # output write
                      + (Dp * Dp + Dp) * 4)

    out_flat = pl.pallas_call(
        functools.partial(_span_conv_kernel, max_width=W,
                          span_mode=span_mode, tl=tl, d=Dp),
        out_shape=jax.ShapeDtypeStruct((B, l_pad, W * Dp), x.dtype),
        grid=(B, num_tiles),
        in_specs=[
            pl.BlockSpec((1, tl, Dp), lambda b, t: (b, t, 0)),   # current tile
            pl.BlockSpec((1, LK, Dp), look_map),                 # lookahead rows
            pl.BlockSpec((Dp, Dp), lambda b, t: (0, 0)),         # proj weight
            pl.BlockSpec((1, Dp), lambda b, t: (0, 0)),          # proj bias
        ],
        out_specs=pl.BlockSpec((1, tl, W * Dp), lambda b, t: (b, t, 0)),
        compiler_params=pltpu.CompilerParams(
            dimension_semantics=("parallel", "parallel"),
            vmem_limit_bytes=48 * 1024 * 1024),
        cost_estimate=pl.CostEstimate(
            flops=flops, transcendentals=0, bytes_accessed=bytes_accessed),
    )(x_in, x_in, w_in, b_in)

    # (B, l_pad, W*Dp) -> (B, l_pad, W, Dp): row-major contiguous, free reshape.
    out = out_flat.reshape(B, l_pad, W, Dp)
    if pad_l or pad_d:
        out = out[:, :L, :, :D]
    return out


def span_conv_ref(x, proj_w, proj_b, *, max_width, span_mode="conv_max"):
    """Pure-JAX reference matching the PyTorch SpanConv.forward."""
    B, L, D = x.shape
    reps = [x]
    for k in range(2, max_width + 1):
        xp = jnp.pad(x, ((0, 0), (0, k - 1), (0, 0)))
        win = jnp.stack([xp[:, j:j + L, :] for j in range(k)], axis=0)  # (k,B,L,D)
        if span_mode == "conv_max":
            reps.append(win.max(axis=0))
        elif span_mode == "conv_mean":
            reps.append(win.mean(axis=0))
        else:  # conv_sum == AvgPool * k == window sum
            reps.append(win.sum(axis=0))
    reps = jnp.stack(reps, axis=-2)                     # (B, L, W, D)
    return jax.nn.relu(reps @ proj_w + proj_b)


if __name__ == "__main__":
    B, L, D = 2, 8, 32
    max_width = 4

    key = jax.random.PRNGKey(0)
    kx, kw, kb = jax.random.split(key, 3)
    x = jax.random.normal(kx, (B, L, D), dtype=jnp.float32)
    proj_w = 0.1 * jax.random.normal(kw, (D, D), dtype=jnp.float32)
    proj_b = 0.1 * jax.random.normal(kb, (D,), dtype=jnp.float32)

    # Single-tile path (lookahead clamp + in-kernel zeroing), all pooling modes.
    for mode in ("conv_max", "conv_mean", "conv_sum"):
        out = span_conv(x, proj_w, proj_b, max_width=max_width, span_mode=mode)
        out = jax.block_until_ready(out)
        ref = span_conv_ref(x, proj_w, proj_b, max_width=max_width,
                            span_mode=mode)
        assert out.shape == (B, L, max_width, D), (mode, out.shape)
        assert jnp.allclose(out, ref, atol=1e-3, rtol=1e-3), f"mismatch ({mode})"

    # Multi-tile path (cross-tile lookahead + L padding + clamp on last tile).
    L2 = 20
    x2 = jax.random.normal(jax.random.PRNGKey(1), (B, L2, D), dtype=jnp.float32)
    out2 = span_conv(x2, proj_w, proj_b, max_width=max_width,
                     span_mode="conv_max", tile_l=8)
    out2 = jax.block_until_ready(out2)
    ref2 = span_conv_ref(x2, proj_w, proj_b, max_width=max_width,
                         span_mode="conv_max")
    assert out2.shape == (B, L2, max_width, D), out2.shape
    assert jnp.allclose(out2, ref2, atol=1e-3, rtol=1e-3), "mismatch (multi-tile)"

    print("KERNEL_OK")
</pallas_src>

<mosaic_0001>
module attributes {stable_mosaic.version = 11 : i64} {
  func.func @_span_conv_kernel(%arg0: i32, %arg1: i32, %arg2: memref<1x8x128xf32, #tpu.memory_space<vmem>>, %arg3: memref<1x8x128xf32, #tpu.memory_space<vmem>>, %arg4: memref<128x128xf32, #tpu.memory_space<vmem>>, %arg5: memref<1x128xf32, #tpu.memory_space<vmem>>, %arg6: memref<1x8x512xf32, #tpu.memory_space<vmem>>) attributes {dimension_semantics = [#tpu.dimension_semantics<parallel>, #tpu.dimension_semantics<parallel>], iteration_bounds = array<i64: 2, 1>, scalar_prefetch = 0 : i64, scratch_operands = 0 : i64, tpu.core_type = #tpu.core_type<tc>, window_params = [{transform_indices = @transform_0, window_bounds = array<i64: 1, 8, 128>}, {transform_indices = @transform_1, window_bounds = array<i64: 1, 8, 128>}, {pipeline_mode = #tpu.pipeline_mode<synchronous>, transform_indices = @transform_2, window_bounds = array<i64: 128, 128>}, {pipeline_mode = #tpu.pipeline_mode<synchronous>, transform_indices = @transform_3, window_bounds = array<i64: 1, 128>}, {transform_indices = @transform_4, window_bounds = array<i64: 1, 8, 512>}]} {
    %c0_i32 = arith.constant 0 : i32
    %0 = arith.cmpi eq, %arg1, %c0_i32 : i32
    %c0 = arith.constant 0 : index
    %c0_0 = arith.constant 0 : index
    %c0_1 = arith.constant 0 : index
    %1 = vector.load %arg2[%c0, %c0_0, %c0_1] : memref<1x8x128xf32, #tpu.memory_space<vmem>>, vector<1x8x128xf32>
    %2 = vector.shape_cast %1 : vector<1x8x128xf32> to vector<8x128xf32>
    %c0_2 = arith.constant 0 : index
    %c0_3 = arith.constant 0 : index
    %c0_4 = arith.constant 0 : index
    %3 = vector.load %arg3[%c0_2, %c0_3, %c0_4] : memref<1x8x128xf32, #tpu.memory_space<vmem>>, vector<1x8x128xf32>
    %4 = vector.shape_cast %3 : vector<1x8x128xf32> to vector<8x128xf32>
    %cst = arith.constant 0.000000e+00 : f32
    %5 = vector.broadcast %cst : f32 to vector<8x128xf32>
    %6 = arith.select %0, %5, %4 : vector<8x128xf32>
    %c0_5 = arith.constant 0 : index
    %c0_6 = arith.constant 0 : index
    %7 = vector.load %arg4[%c0_5, %c0_6] : memref<128x128xf32, #tpu.memory_space<vmem>>, vector<128x128xf32>
    %c0_7 = arith.constant 0 : index
    %c0_8 = arith.constant 0 : index
    %8 = vector.load %arg5[%c0_7, %c0_8] : memref<1x128xf32, #tpu.memory_space<vmem>>, vector<1x128xf32>
    %9 = vector.shape_cast %8 : vector<1x128xf32> to vector<1x128xf32>
    %10 = vector.broadcast %9 : vector<1x128xf32> to vector<8x128xf32>
    %11 = tpu.concatenate %2, %6 in 0 : vector<8x128xf32>, vector<8x128xf32> -> vector<16x128xf32>
    %cst_9 = arith.constant dense<0.000000e+00> : vector<8x128xf32>
    %12 = tpu.matmul %2, %7, %cst_9 {dimension_numbers = #tpu.dot_dimension_numbers<[1], [0], [0], [1], [0, 0, 1, 1], [], []>} : vector<8x128xf32>, vector<128x128xf32>, vector<8x128xf32> -> vector<8x128xf32>
    %13 = arith.addf %12, %10 : vector<8x128xf32>
    %cst_10 = arith.constant 0.000000e+00 : f32
    %14 = vector.broadcast %cst_10 : f32 to vector<8x128xf32>
    %15 = arith.maximumf %13, %14 : vector<8x128xf32>
    %c0_11 = arith.constant 0 : index
    %c0_12 = arith.constant 0 : index
    %c0_13 = arith.constant 0 : index
    %16 = vector.load %arg6[%c0_11, %c0_12, %c0_13] : memref<1x8x512xf32, #tpu.memory_space<vmem>>, vector<1x8x128xf32>
    %17 = vector.shape_cast %16 : vector<1x8x128xf32> to vector<8x128xf32>
    %18 = vector.shape_cast %15 : vector<8x128xf32> to vector<1x8x128xf32>
    tpu.vector_store %arg6[%c0_11, %c0_12, %c0_13], %18 {strides = array<i32>} : memref<1x8x512xf32, #tpu.memory_space<vmem>>, vector<1x8x128xf32>,
    %19 = vector.extract_strided_slice %11 {offsets = [1, 0], sizes = [8, 128], strides = [1, 1]} : vector<16x128xf32> to vector<8x128xf32>
    %20 = arith.maximumf %2, %19 : vector<8x128xf32>
    %cst_14 = arith.constant dense<0.000000e+00> : vector<8x128xf32>
    %21 = tpu.matmul %20, %7, %cst_14 {dimension_numbers = #tpu.dot_dimension_numbers<[1], [0], [0], [1], [0, 0, 1, 1], [], []>} : vector<8x128xf32>, vector<128x128xf32>, vector<8x128xf32> -> vector<8x128xf32>
    %22 = arith.addf %21, %10 : vector<8x128xf32>
    %cst_15 = arith.constant 0.000000e+00 : f32
    %23 = vector.broadcast %cst_15 : f32 to vector<8x128xf32>
    %24 = arith.maximumf %22, %23 : vector<8x128xf32>
    %c0_16 = arith.constant 0 : index
    %c0_17 = arith.constant 0 : index
    %c128 = arith.constant 128 : index
    %25 = vector.load %arg6[%c0_16, %c0_17, %c128] : memref<1x8x512xf32, #tpu.memory_space<vmem>>, vector<1x8x128xf32>
    %26 = vector.shape_cast %25 : vector<1x8x128xf32> to vector<8x128xf32>
    %27 = vector.shape_cast %24 : vector<8x128xf32> to vector<1x8x128xf32>
    tpu.vector_store %arg6[%c0_16, %c0_17, %c128], %27 {strides = array<i32>} : memref<1x8x512xf32, #tpu.memory_space<vmem>>, vector<1x8x128xf32>,
    %28 = vector.extract_strided_slice %11 {offsets = [2, 0], sizes = [8, 128], strides = [1, 1]} : vector<16x128xf32> to vector<8x128xf32>
    %29 = arith.maximumf %20, %28 : vector<8x128xf32>
    %cst_18 = arith.constant dense<0.000000e+00> : vector<8x128xf32>
    %30 = tpu.matmul %29, %7, %cst_18 {dimension_numbers = #tpu.dot_dimension_numbers<[1], [0], [0], [1], [0, 0, 1, 1], [], []>} : vector<8x128xf32>, vector<128x128xf32>, vector<8x128xf32> -> vector<8x128xf32>
    %31 = arith.addf %30, %10 : vector<8x128xf32>
    %cst_19 = arith.constant 0.000000e+00 : f32
    %32 = vector.broadcast %cst_19 : f32 to vector<8x128xf32>
    %33 = arith.maximumf %31, %32 : vector<8x128xf32>
    %c0_20 = arith.constant 0 : index
    %c0_21 = arith.constant 0 : index
    %c256 = arith.constant 256 : index
    %34 = vector.load %arg6[%c0_20, %c0_21, %c256] : memref<1x8x512xf32, #tpu.memory_space<vmem>>, vector<1x8x128xf32>
    %35 = vector.shape_cast %34 : vector<1x8x128xf32> to vector<8x128xf32>
    %36 = vector.shape_cast %33 : vector<8x128xf32> to vector<1x8x128xf32>
    tpu.vector_store %arg6[%c0_20, %c0_21, %c256], %36 {strides = array<i32>} : memref<1x8x512xf32, #tpu.memory_space<vmem>>, vector<1x8x128xf32>,
    %37 = vector.extract_strided_slice %11 {offsets = [3, 0], sizes = [8, 128], strides = [1, 1]} : vector<16x128xf32> to vector<8x128xf32>
    %38 = arith.maximumf %29, %37 : vector<8x128xf32>
    %cst_22 = arith.constant dense<0.000000e+00> : vector<8x128xf32>
    %39 = tpu.matmul %38, %7, %cst_22 {dimension_numbers = #tpu.dot_dimension_numbers<[1], [0], [0], [1], [0, 0, 1, 1], [], []>} : vector<8x128xf32>, vector<128x128xf32>, vector<8x128xf32> -> vector<8x128xf32>
    %40 = arith.addf %39, %10 : vector<8x128xf32>
    %cst_23 = arith.constant 0.000000e+00 : f32
    %41 = vector.broadcast %cst_23 : f32 to vector<8x128xf32>
    %42 = arith.maximumf %40, %41 : vector<8x128xf32>
    %c0_24 = arith.constant 0 : index
    %c0_25 = arith.constant 0 : index
    %c384 = arith.constant 384 : index
    %43 = vector.load %arg6[%c0_24, %c0_25, %c384] : memref<1x8x512xf32, #tpu.memory_space<vmem>>, vector<1x8x128xf32>
    %44 = vector.shape_cast %43 : vector<1x8x128xf32> to vector<8x128xf32>
    %45 = vector.shape_cast %42 : vector<8x128xf32> to vector<1x8x128xf32>
    tpu.vector_store %arg6[%c0_24, %c0_25, %c384], %45 {strides = array<i32>} : memref<1x8x512xf32, #tpu.memory_space<vmem>>, vector<1x8x128xf32>,
    return
  }
  func.func @transform_0(%arg0: i32, %arg1: i32) -> (i32, i32, i32) {
    %c0_i32 = arith.constant 0 : i32
    %c0_i32_0 = arith.constant 0 : i32
    return %arg0, %arg1, %c0_i32 : i32, i32, i32
  }
  func.func @transform_1(%arg0: i32, %arg1: i32) -> (i32, i32, i32) {
    %c1_i32 = arith.constant 1 : i32
    %0 = arith.addi %arg1, %c1_i32 : i32
    %c1_i32_0 = arith.constant 1 : i32
    %1 = arith.muli %0, %c1_i32_0 : i32
    %c0_i32 = arith.constant 0 : i32
    %2 = arith.minsi %1, %c0_i32 : i32
    %c0_i32_1 = arith.constant 0 : i32
    %c0_i32_2 = arith.constant 0 : i32
    return %arg0, %2, %c0_i32_1 : i32, i32, i32
  }
  func.func @transform_2(%arg0: i32, %arg1: i32) -> (i32, i32) {
    %c0_i32 = arith.constant 0 : i32
    %c0_i32_0 = arith.constant 0 : i32
    %c0_i32_1 = arith.constant 0 : i32
    return %c0_i32, %c0_i32_0 : i32, i32
  }
  func.func @transform_3(%arg0: i32, %arg1: i32) -> (i32, i32) {
    %c0_i32 = arith.constant 0 : i32
    %c0_i32_0 = arith.constant 0 : i32
    %c0_i32_1 = arith.constant 0 : i32
    return %c0_i32, %c0_i32_0 : i32, i32
  }
  func.func @transform_4(%arg0: i32, %arg1: i32) -> (i32, i32, i32) {
    %c0_i32 = arith.constant 0 : i32
    %c0_i32_0 = arith.constant 0 : i32
    return %arg0, %arg1, %c0_i32 : i32, i32, i32
  }
}

</mosaic_0001>

<bundles_post_ra>
// kernel: tpu_custom_call.1
= control target key start
LH: loop header
LB: loop body
LE: loop exit
PB: predicated region body
PF: predicated region fallthrough
CT: control target
= control target key end

     0   :  { %s1690_s0 = inlined_call_operand.hbm [shape: f32[2,8,128], index: 0, kind: input, shape index: {}]   ;;  %s1691_s1 = inlined_call_operand.hbm [shape: f32[2,8,128], index: 1, kind: input, shape index: {}]   ;;  %s1692_s2 = inlined_call_operand.hbm [shape: f32[128,128], index: 2, kind: input, shape index: {}]   ;;  %s1693_s3 = inlined_call_operand.vmem [shape: f32[1,128], index: 3, kind: input, shape index: {}]   ;;  %s1694_s4 = inlined_call_operand.hbm [shape: f32[2,8,512], index: 4, kind: output, shape index: {}]  }
   0x1   :  { %1701 = sst [smem:[#allocation15_spill]] %s1692_s2 }
   0x2   :  { %9 = vsyncpa [#allocation3], 0 }
   0x3   :  { %11 = vsyncpa [#allocation3 + $0x1], 0 }
   0x4   :  { %12 = vsyncpa [#allocation6], 0 }
   0x5   :  { %14 = vsyncpa [#allocation6 + $0x1], 0 }
   0x6   :  { %15 = vsyncpa [#allocation4], 0 }
   0x7   :  { %17 = vsyncpa [#allocation4 + $0x1], 0  ;;  %s1388_s15 = smov 0   ;;  %s1390_s16 = smov 0  }
   0x8   :  { %s1392_s17 = smov 0   ;;  %s1394_s18 = smov 0  }
   0x9   :  { %s1396_s19 = smov 0   ;;  %s1398_s20 = smov 0  }
   0xa LB: > { %1702 = sst [smem:[#allocation13_spill]] %s1348_s19  ;;  %s1419_s21 = sadd.s32 4294967295, %s1352_s20   ;;  %s1352_s20 = sphi %s1398_s20, %s23_s20   ;;  %s1348_s19 = sphi %s1396_s19, %s1721_s19   ;;  %s1344_s18 = sphi %s1394_s18, %s1720_s18   ;;  %s1340_s17 = sphi %s1392_s17, %s1724_s17   ;;  %s1336_s16 = sphi %s1390_s16, %s1723_s16   ;;  %s1332_s15 = sphi %s1388_s15, %s1722_s15  }
   0xb   : > { %s767_s22 = sadd.s32 4294967294, %s1352_s20   ;;  %p57_p0 = scmp.ne.s32.totalorder %s1336_s16, %s1332_s15 }
   0xc   : > { %p1695_p1 = scmp.eq.s32.totalorder %s1419_s21, 0  ;;  %p165_p3 = scmp.eq.s32.totalorder %s767_s22, 1 }
   0xd   : > { %p768_p5 = scmp.ge.s32.totalorder %s1352_s20, 1  ;;  %p172_p7 = scmp.lt.s32.totalorder %s1352_s20, 3 }
   0xe   : > { %p1428_p4 = por %p1695_p1, %p57_p0  ;;  %p1433_p6 = por %p165_p3, %p57_p0 }
   0xf   : > { %p1438_p8 = pnand %p768_p5, %p172_p7  ;;  %s1354_s26 = smov [#allocation7]  }
  0x10   : > { %s1703_s23 = scalar_select %p1428_p4, 1, 0 }
  0x11   : > { %s1704_s24 = scalar_select %p1433_p6, 1, 0 }
  0x12   : > { %s1705_s25 = scalar_select %p1438_p8, 1, 0 }
  0x13   : > { %s184_s27 = sshll.u32 %s1354_s26, 4  ;;  %p1101_p9 = pneg %p1438_p8  ;;  %s185_s27 = int_to_ptr.vmem [resolvable:$true] %s184_s27 }
  0x14   : > { %s35_s29 = sadd.s32 1, %s1348_s19  ;;  %s1707_s2 = sld [smem:[#allocation15_spill]] }
  0x15   : > { %p1447_p11 = pnand %p1101_p9, %p1695_p1 }
  0x17   : > { %p1176_p13 = pneg %p1447_p11 }
  0x1a   : > { %s1174_s6 = scalar_lea.hbm %s1707_s2, 2048 }
  0x1b   : > { %p1175_p12 = scmp.ne.s32.totalorder %s1707_s2, %s1174_s6  ;;  %p1181_p5 = scmp.lt.u32.totalorder %s1174_s6, %s1707_s2 }
  0x1d   : > { %p1177_p0 = pnand %p1176_p13, %p1175_p12 }
  0x1f   : > { %p1178_p3 = pneg %p1177_p0 }
  0x21   : > { %p1183_p7 = pnand %p1181_p5, %p1178_p3 }
  0x23   : > { %1186 = shalt.err (!%p1183_p7)
}
  0x24   : > { %s1187_s11 = scalar_lea.vmem %s185_s27, 2048  ;;  %p1195_p2 = scmp.lt.s32.totalorder %s185_s27, %s185_s27 }
  0x25   : > { %p1188_p9 = scmp.ne.s32.totalorder %s185_s27, %s1187_s11  ;;  %p1196_p6 = scmp.lt.s32.totalorder %s1187_s11, %s1187_s11 }
  0x27   : > { %p1190_p10 = pnand %p1188_p9, %p1176_p13  ;;  %p1197_p4 = por %p1196_p6, %p1195_p2 }
  0x29   : > { %p1191_p1 = pneg %p1190_p10 }
  0x2b   : > { %p1198_p8 = pnand %p1197_p4, %p1191_p1 }
  0x2d   : > { %1201 = shalt.err (!%p1198_p8)
}
  0x2e   : > { %s1355_s12 = smov 128   ;;  %s1356_s13 = smov 8  }
  0x2f   : > { %1104 = dma.hbm_to_vmem [thread:$0]  (!%p1447_p11), %s1707_s2, 2048, %s185_s27, [#allocation6], %s1355_s12, %s1355_s12, %s1356_s13  }
  0x30   : > { %p37_p1 = scmp.ge.s32.totalorder %s35_s29, 2  ;;  %s44_s26 = sadd.s32 1, %s1340_s17 }
  0x31   : > { %p51_p2 = scmp.ne.s32.totalorder %s1340_s17, %s1336_s16  ;;  %p52_p4 = scmp.eq.s32.totalorder %s1352_s20, 0 }
  0x32   : > { %s1726_s29 = smov (%p37_p1, %s35_s29), 0  ;;  %p1710_p8 = scmp.eq.s32.totalorder %s1419_s21, 1 }
  0x33   : > { %1708 = sst [smem:[#allocation14_spill]] %s1726_s29  ;;  %p1474_p6 = por %p52_p4, %p51_p2 }
  0x34   : > { %p1480_p10 = por %p1710_p8, %p51_p2  ;;  %s39_s5 = ssub.s32 %s1348_s19, %s1726_s29 }
  0x35   : > { %p1117_p11 = scmp.lt.s32.totalorder %s1352_s20, 2  ;;  %p42_p12 = scmp.eq.s32.totalorder %s39_s5, 0 }
  0x36   : > { %s1711_s28 = scalar_select %p1480_p10, 1, 0 }
  0x37   : > { %s201_s27 = sand.u32 1, %s1340_s17   ;;  %s772_s8 = sshll.u32 %s1348_s19, 7 }
  0x38   : > { %s1488_s6 = sshll.u32 %s201_s27, 3  ;;  %s1497_s11 = scalar_lea.hbm %s1690_s0, %s772_s8 }
  0x39   : > { %s1491_s7 = scalar_select %p42_p12, %s1340_s17, %s44_s26  }
  0x3a   : > { %s205_s12 = scalar_lea.vmem [#allocation2], %s1488_s6  ;;  %p1504_p13 = pnand %p1117_p11, %p1474_p6 }
  0x3b   : > { %s213_s13 = sshll.u32 %s205_s12, 4  ;;  %s1511_s5 = scalar_lea.hbm %s1691_s1, %s772_s8  ;;  %s1500_s13 = int_to_ptr.vmem [resolvable:$true] %s213_s13 }
  0x3c   : > { %s220_s9 = sand.u32 1, %s1352_s20   ;;  %s202_s10 = scalar_lea.sflag [#allocation3], %s201_s27 }
  0x3d   : > { %s1202_s2 = scalar_lea.hbm %s1497_s11, 128  ;;  %p1204_p3 = pneg %p1504_p13 }
  0x3e   : > { %p1203_p0 = scmp.ne.s32.totalorder %s1497_s11, %s1202_s2  ;;  %s1207_s29 = scalar_lea.hbm %s1690_s0, 256 }
  0x3f   : > { %p1208_p9 = scmp.lt.u32.totalorder %s1497_s11, %s1690_s0  ;;  %p1209_p1 = scmp.lt.u32.totalorder %s1207_s29, %s1202_s2 }
  0x40   : > { %p1205_p5 = pnand %p1204_p3, %p1203_p0  ;;  %p1211_p4 = scmp.lt.u32.totalorder %s1202_s2, %s1497_s11 }
  0x41   : > { %p1210_p2 = por %p1209_p1, %p1208_p9 }
  0x42   : > { %p1206_p7 = pneg %p1205_p5 }
  0x43   : > { %p1212_p6 = por %p1211_p4, %p1210_p2 }
  0x45   : > { %p1213_p8 = pnand %p1212_p6, %p1206_p7 }
  0x47   : > { %1216 = shalt.err (!%p1213_p8)
}
  0x48   : > { %s1217_s27 = scalar_lea.vmem %s1500_s13, 128  ;;  %s1357_s8 = smov [#allocation2]  }
  0x49   : > { %p1218_p11 = scmp.ne.s32.totalorder %s1500_s13, %s1217_s27  ;;  %s1222_s26 = sshll.u32 %s1357_s8, 4  ;;  %s1223_s26 = int_to_ptr.vmem [resolvable:$false] %s1222_s26 }
  0x4a   : > { %s1224_s19 = scalar_lea.vmem %s1223_s26, 256  ;;  %p1225_p5 = scmp.lt.s32.totalorder %s1500_s13, %s1223_s26 }
  0x4b   : > { %p1220_p12 = pnand %p1218_p11, %p1204_p3  ;;  %p1226_p9 = scmp.lt.s32.totalorder %s1224_s19, %s1217_s27 }
  0x4d   : > { %p1221_p0 = pneg %p1220_p12  ;;  %p1227_p1 = por %p1226_p9, %p1225_p5 }
  0x4f   : > { %p1228_p2 = pnand %p1227_p1, %p1221_p0 }
  0x51   : > { %1231 = shalt.err (!%p1228_p2)
}
  0x52   : > { %1108 = dma.hbm_to_vmem [thread:$0]  (!%p1504_p13), %s1497_s11, 128, %s1500_s13, %s202_s10  }
  0x53   : > { %s224_s2 = scalar_lea.vmem [#allocation5], %s1488_s6  ;;  %s221_s30 = scalar_lea.sflag [#allocation6], %s220_s9 }
  0x54   : > { %s235_s29 = sshll.u32 %s224_s2, 4  ;;  %s1232_s12 = scalar_lea.hbm %s1511_s5, 128  ;;  %s236_s29 = int_to_ptr.vmem [resolvable:$true] %s235_s29 }
  0x55   : > { %p1233_p7 = scmp.ne.s32.totalorder %s1511_s5, %s1232_s12  ;;  %s1237_s8 = scalar_lea.hbm %s1691_s1, 256 }
  0x56   : > { %p1238_p8 = scmp.lt.u32.totalorder %s1511_s5, %s1691_s1  ;;  %p1239_p11 = scmp.lt.u32.totalorder %s1237_s8, %s1232_s12 }
  0x57   : > { %p1235_p4 = pnand %p1233_p7, %p1204_p3  ;;  %p1241_p0 = scmp.lt.u32.totalorder %s1232_s12, %s1511_s5 }
  0x58   : > { %p1240_p12 = por %p1239_p11, %p1238_p8 }
  0x59   : > { %p1236_p6 = pneg %p1235_p4 }
  0x5a   : > { %p1242_p5 = por %p1241_p0, %p1240_p12 }
  0x5c   : > { %p1243_p9 = pnand %p1242_p5, %p1236_p6 }
  0x5e   : > { %1246 = shalt.err (!%p1243_p9)
}
  0x5f   : > { %s1247_s6 = scalar_lea.vmem %s236_s29, 128  ;;  %s1358_s11 = smov [#allocation5]  }
  0x60   : > { %p1248_p1 = scmp.ne.s32.totalorder %s236_s29, %s1247_s6  ;;  %s1252_s13 = sshll.u32 %s1358_s11, 4  ;;  %s1253_s13 = int_to_ptr.vmem [resolvable:$false] %s1252_s13 }
  0x61   : > { %s1254_s9 = scalar_lea.vmem %s1253_s13, 256  ;;  %p1255_p4 = scmp.lt.s32.totalorder %s236_s29, %s1253_s13 }
  0x62   : > { %p1250_p2 = pnand %p1248_p1, %p1204_p3  ;;  %p1256_p10 = scmp.lt.s32.totalorder %s1254_s9, %s1247_s6 }
  0x64   : > { %p1251_p7 = pneg %p1250_p2  ;;  %p1257_p8 = por %p1256_p10, %p1255_p4 }
  0x66   : > { %p1258_p11 = pnand %p1257_p8, %p1251_p7 }
  0x68   : > { %1261 = shalt.err (!%p1258_p11)
}
  0x69   : > { %1111 = dma.hbm_to_vmem [thread:$0]  (!%p1504_p13), %s1511_s5, 128, %s236_s29, %s221_s30  }
  0x6a   : > { %p1713_p6 = scmp.ne.s32.totalorder %s1705_s25, 0 }
  0x6b   : > { %s1564_s10 = sand.u32 (!%p1713_p6), 1, %s1336_s16   ;;  %p1714_p10 = scmp.ne.s32.totalorder (!%p1713_p6), %s1703_s23, 0 }
  0x6c   : > { %244 = sbr.rel (%p1713_p6) target bundleno = 418 (0x1a2), region = 36  ;;  %s776_s2 = sshll.u32 (!%p1713_p6), %s1564_s10, 3 }
  0x6d   : > { %s247_s12 = scalar_lea.sflag (!%p1713_p6), [#allocation3], %s1564_s10  ;;  %s1568_s22 = scalar_lea.vmem (!%p1713_p6), [#allocation2], %s776_s2 }
  0x73   : > { %1315 = dma.done.wait (%p1714_p10), %s247_s12, 128  }
  0x74   : > { %1317 = vsyncadd (%p1714_p10), %s247_s12, 4294967168  ;;  %s255_s14 = sand.u32 1, %s1419_s21  }
  0x75   : > { %s256_s25 = scalar_lea.sflag [#allocation6], %s255_s14 }
  0x76   : > { %1319 = dma.done.wait (%p1714_p10), %s256_s25, 128  }
  0x77   : > { %1321 = vsyncadd (%p1714_p10), %s256_s25, 4294967168  ;;  %p1715_p13 = scmp.eq.s32.totalorder %s1419_s21, 0 }
  0x79   : > { %1323 = dma.done.wait (%p1715_p13), [#allocation6], 2048   ;;  %p1716_p3 = pmov %p1715_p13 }
  0x7a   : > { %v1359_v0 = vmov 0.0|0.0   ;;  %vm1360_vm0 = vmmov 0   ;;  %v1361_v1 = vmov 0.0   ;;  %v303_v2 = vld [vmem:[#allocation7] sm:$0xff]  ;;  %v304_v3 = vld [vmem:[#allocation7 + $0x8] sm:$0xff]  ;;  %v305_v4 = vld [vmem:[#allocation7 + $0x10] sm:$0xff] }
  0x7b   : > { %1325 = vsyncadd (%p1716_p3), [#allocation6], 4294965248  ;;  %995 = vmatprep.subr.bf16.mxu0 %v1359_v0  ;;  %1019 = vmatprep.subr.bf16.mxu1 %v1359_v0  ;;  %v996_v5 = vpack.c.bf16 %v304_v3, %v303_v2  ;;  %v306_v6 = vld [vmem:[#allocation7 + $0x18] sm:$0xff]  ;;  %v307_v8 = vld [vmem:[#allocation7 + $0x20] sm:$0xff]  ;;  %v402_v25 = vrot.slane %v1361_v1, 1  ;;  %vm400_vm1 = vcmask 1046528  }
  0x7c   : > { %887 = vmatprep.mubr.msk.f32.mxu0 %vm1360_vm0, %v1361_v1  ;;  %922 = vmatprep.mubr.msk.f32.mxu1 %vm1360_vm0, %v1361_v1  ;;  %v1589_v7 = vpack.c.bf16 %v306_v6, %v305_v4  ;;  %v308_v9 = vld [vmem:[#allocation7 + $0x28] sm:$0xff]  ;;  %v309_v11 = vld [vmem:[#allocation7 + $0x30] sm:$0xff]  ;;  %v310_v12 = vld [vmem:[#allocation7 + $0x38] sm:$0xff]  ;;  %v480_v32 = vrot.slane %v1361_v1, 2  ;;  %vm478_vm2 = vcmask 1045504   ;;  %v558_v35 = vrot.slane %v1361_v1, 3 }
  0x7d   : > { %997 = vmatpush3.bf16.msra.mxu0 %v996_v5  ;;  %1021 = vmatpush3.bf16.msra.mxu1 %v996_v5  ;;  %v1002_v10 = vpack.c.bf16 %v308_v9, %v307_v8  ;;  %v1005_v13 = vpack.c.bf16 %v310_v12, %v309_v11  ;;  %v311_v14 = vld [vmem:[#allocation7 + $0x40] sm:$0xff]  ;;  %v312_v15 = vld [vmem:[#allocation7 + $0x48] sm:$0xff]  ;;  %v313_v17 = vld [vmem:[#allocation7 + $0x50] sm:$0xff]  ;;  %vm556_vm3 = vcmask 1044480   ;;  %s779_s5 = sshll.u32 %s1564_s10, 5  ;;  %s786_s30 = sshll.u32 %s1344_s18, 9 }
  0x7e   : > { %998 = vmatprep.subr.bf16.mxu0 %v1359_v0  ;;  %1022 = vmatprep.subr.bf16.mxu1 %v1359_v0  ;;  %v1008_v16 = vpack.c.bf16 %v312_v15, %v311_v14  ;;  %v314_v18 = vld [vmem:[#allocation7 + $0x58] sm:$0xff]  ;;  %v315_v20 = vld [vmem:[#allocation7 + $0x60] sm:$0xff]  ;;  %v316_v21 = vld [vmem:[#allocation7 + $0x68] sm:$0xff]  ;;  %s292_s29 = scalar_lea.vmem [#allocation8], %s779_s5  ;;  %s1641_s19 = scalar_lea.hbm %s1694_s4, %s786_s30 }
  0x7f   : > { %v1011_v19 = vpack.c.bf16 %v314_v18, %v313_v17  ;;  %v297_v22 = vld [vmem:[%s1568_s22] sm:$0xff]  ;;  %v1014_v23 = vpack.c.bf16 %v316_v21, %v315_v20  ;;  %v317_v26 = vld [vmem:[#allocation7 + $0x70] sm:$0xff]  ;;  %v318_v27 = vld [vmem:[#allocation7 + $0x78] sm:$0xff]  ;;  %s651_s27 = sshll.u32 %s292_s29, 4  ;;  %s635_s18 = scalar_lea.sflag [#allocation4], %s1564_s10  ;;  %s1643_s27 = int_to_ptr.vmem [resolvable:$true] %s651_s27 }
  0x80   : > { %v401_v24 = vrot.slane %v297_v22, 1  ;;  %v1017_v28 = vpack.c.bf16 %v318_v27, %v317_v26  ;;  %v479_v31 = vrot.slane %v297_v22, 2  ;;  %v557_v33 = vrot.slane %v297_v22, 3  ;;  %v780_v39 = vld [vmem:[%s1693_s3] ss:$0 sm:$0xff]  ;;  %s1262_s6 = scalar_lea.vmem %s1643_s27, 512 }
  0x81   : > { %1000 = vmatpush3.bf16.msra.mxu0 %v1589_v7  ;;  %1024 = vmatpush3.bf16.msra.mxu1 %v1589_v7  ;;  %p1263_p12 = scmp.ne.s32.totalorder %s1643_s27, %s1262_s6  ;;  %p1717_p0 = scmp.ne.s32.totalorder %s1711_s28, 0 }
  0x82   : > { %1001 = vmatprep.subr.bf16.mxu0 %v1359_v0  ;;  %1025 = vmatprep.subr.bf16.mxu1 %v1359_v0  ;;  %v403_v29 = vsel %vm400_vm1, %v401_v24, %v402_v25  ;;  %v481_v34 = vsel %vm478_vm2, %v479_v31, %v480_v32  ;;  %v559_v37 = vsel %vm556_vm3, %v557_v33, %v558_v35  ;;  %s1362_s11 = smov [#allocation8]  }
  0x83   : > { %v405_v30 = vmax.f32 %v297_v22, %v403_v29  ;;  %p1264_p5 = pnand %p1263_p12, %p1717_p0  ;;  %s1266_s13 = sshll.u32 %s1362_s11, 4  ;;  %s1267_s13 = int_to_ptr.vmem [resolvable:$false] %s1266_s13 }
  0x84   : > { %s1268_s9 = scalar_lea.vmem %s1267_s13, 1024  ;;  %p1269_p1 = scmp.lt.s32.totalorder %s1643_s27, %s1267_s13 }
  0x85   : > { %1003 = vmatpush3.bf16.msra.mxu0 %v1002_v10  ;;  %1027 = vmatpush3.bf16.msra.mxu1 %v1002_v10  ;;  %v483_v36 = vmax.f32 %v405_v30, %v481_v34  ;;  %p1265_p9 = pneg %p1264_p5  ;;  %p1270_p2 = scmp.lt.s32.totalorder %s1268_s9, %s1262_s6 }
  0x86   : > { %1004 = vmatprep.subr.bf16.mxu0 %v1359_v0  ;;  %1028 = vmatprep.subr.bf16.mxu1 %v1359_v0 }
  0x87   : > { %v561_v38 = vmax.f32 %v483_v36, %v559_v37  ;;  %p1271_p7 = por %p1270_p2, %p1269_p1 }
  0x89   : > { %1006 = vmatpush3.bf16.msra.mxu0 %v1005_v13  ;;  %1030 = vmatpush3.bf16.msra.mxu1 %v1005_v13  ;;  %p1272_p4 = pnand %p1271_p7, %p1265_p9 }
  0x8a   : > { %1007 = vmatprep.subr.bf16.mxu0 %v1359_v0  ;;  %1031 = vmatprep.subr.bf16.mxu1 %v1359_v0 }
  0x8d   : > { %1009 = vmatpush3.bf16.msra.mxu0 %v1008_v16  ;;  %1033 = vmatpush3.bf16.msra.mxu1 %v1008_v16 }
  0x8e   : > { %1010 = vmatprep.subr.bf16.mxu0 %v1359_v0  ;;  %1034 = vmatprep.subr.bf16.mxu1 %v1359_v0 }
  0x91   : > { %1012 = vmatpush3.bf16.msra.mxu0 %v1011_v19  ;;  %1036 = vmatpush3.bf16.msra.mxu1 %v1011_v19 }
  0x92   : > { %1013 = vmatprep.subr.bf16.mxu0 %v1359_v0  ;;  %1037 = vmatprep.subr.bf16.mxu1 %v1359_v0 }
  0x95   : > { %1015 = vmatpush3.bf16.msra.mxu0 %v1014_v23  ;;  %1039 = vmatpush3.bf16.msra.mxu1 %v1014_v23 }
  0x96   : > { %1016 = vmatprep.subr.bf16.mxu0 %v1359_v0  ;;  %1040 = vmatprep.subr.bf16.mxu1 %v1359_v0 }
  0x99   : > { %1018 = vmatpush3.bf16.msra.mxu0 %v1017_v28  ;;  %1042 = vmatpush3.bf16.msra.mxu1 %v1017_v28 }
  0x9a   : > { %1043 = vmatprep.subr.bf16.mxu0 %v1359_v0  ;;  %1067 = vmatprep.subr.bf16.mxu1 %v1359_v0 }
  0x9c   : > { %888 = vmatmul.mubr.f32.vlgmr.msra.gmra.mrb[0].mxu0 %v297_v22  ;;  %923 = vmatmul.mubr.f32.vlgmr.msra.gmra.mrb[0].mxu1 %v405_v30 }
  0x9d   : > { %1045 = vmatpush3.bf16.msra.mxu0 %v996_v5  ;;  %1069 = vmatpush3.bf16.msra.mxu1 %v996_v5 }
  0x9e   : > { %1046 = vmatprep.subr.bf16.mxu0 %v1359_v0  ;;  %1070 = vmatprep.subr.bf16.mxu1 %v1359_v0 }
  0x9f   : > { %957 = vmatprep.mubr.msk.f32.mxu0 %vm1360_vm0, %v1361_v1  ;;  %992 = vmatprep.mubr.msk.f32.mxu1 %vm1360_vm0, %v1361_v1 }
  0xa1   : > { %1048 = vmatpush3.bf16.msra.mxu0 %v1589_v7  ;;  %1072 = vmatpush3.bf16.msra.mxu1 %v1589_v7 }
  0xa2   : > { %1049 = vmatprep.subr.bf16.mxu0 %v1359_v0  ;;  %1073 = vmatprep.subr.bf16.mxu1 %v1359_v0 }
  0xa5   : > { %1051 = vmatpush3.bf16.msra.mxu0 %v1002_v10  ;;  %1075 = vmatpush3.bf16.msra.mxu1 %v1002_v10 }
  0xa6   : > { %1052 = vmatprep.subr.bf16.mxu0 %v1359_v0  ;;  %1076 = vmatprep.subr.bf16.mxu1 %v1359_v0 }
  0xa9   : > { %1054 = vmatpush3.bf16.msra.mxu0 %v1005_v13  ;;  %1078 = vmatpush3.bf16.msra.mxu1 %v1005_v13 }
  0xaa   : > { %1055 = vmatprep.subr.bf16.mxu0 %v1359_v0  ;;  %1079 = vmatprep.subr.bf16.mxu1 %v1359_v0 }
  0xad   : > { %1057 = vmatpush3.bf16.msra.mxu0 %v1008_v16  ;;  %1081 = vmatpush3.bf16.msra.mxu1 %v1008_v16 }
  0xae   : > { %1058 = vmatprep.subr.bf16.mxu0 %v1359_v0  ;;  %1082 = vmatprep.subr.bf16.mxu1 %v1359_v0 }
  0xb1   : > { %1060 = vmatpush3.bf16.msra.mxu0 %v1011_v19  ;;  %1084 = vmatpush3.bf16.msra.mxu1 %v1011_v19 }
  0xb2   : > { %1061 = vmatprep.subr.bf16.mxu0 %v1359_v0  ;;  %1085 = vmatprep.subr.bf16.mxu1 %v1359_v0 }
  0xb5   : > { %1063 = vmatpush3.bf16.msra.mxu0 %v1014_v23  ;;  %1087 = vmatpush3.bf16.msra.mxu1 %v1014_v23 }
  0xb6   : > { %1064 = vmatprep.subr.bf16.mxu0 %v1359_v0  ;;  %1088 = vmatprep.subr.bf16.mxu1 %v1359_v0 }
  0xb9   : > { %1066 = vmatpush3.bf16.msra.mxu0 %v1017_v28  ;;  %1090 = vmatpush3.bf16.msra.mxu1 %v1017_v28 }
  0xbc   : > { %958 = vmatmul.mubr.f32.vlgmr.msra.gmra.mrb[2].mxu0 %v483_v36  ;;  %993 = vmatmul.mubr.f32.vlgmr.msra.gmra.mrb[2].mxu1 %v561_v38 }
 0x16f   : > { %v392_v40 = vpop.f32.mrb[0].mxu0  ;;  %v472_v41 = vpop.f32.mrb[0].mxu1 }
 0x170   : > { %v393_v42 = vadd.f32 %v780_v39, %v392_v40  ;;  %v473_v43 = vadd.f32 %v780_v39, %v472_v41  ;;  %v889_v44 = vpop.f32.mrb[1].mxu0  ;;  %v924_v45 = vpop.f32.mrb[1].mxu1 }
 0x172   : > { %v396_v46 = vmax.f32 %v393_v42, 0.0  ;;  %v476_v47 = vmax.f32 %v473_v43, 0.0 }
 0x174   : > { %397 = vst [vmem:[%s292_s29] sm:$0xff] %v396_v46  ;;  %477 = vst [vmem:[%s292_s29 + $0x8] sm:$0xff] %v476_v47 }
 0x18f   : > { %v550_v48 = vpop.f32.mrb[2].mxu0  ;;  %v628_v49 = vpop.f32.mrb[2].mxu1 }
 0x190   : > { %v551_v50 = vadd.f32 %v780_v39, %v550_v48  ;;  %v629_v51 = vadd.f32 %v780_v39, %v628_v49  ;;  %v959_v52 = vpop.f32.mrb[3].mxu0  ;;  %v994_v53 = vpop.f32.mrb[3].mxu1 }
 0x192   : > { %v554_v54 = vmax.f32 %v551_v50, 0.0  ;;  %v632_v55 = vmax.f32 %v629_v51, 0.0 }
 0x194   : > { %555 = vst [vmem:[%s292_s29 + $0x10] sm:$0xff] %v554_v54  ;;  %633 = vst [vmem:[%s292_s29 + $0x18] sm:$0xff] %v632_v55 }
 0x195   : > { %1275 = shalt.err (!%p1272_p4)
}
 0x196   : > { %s1276_s10 = scalar_lea.hbm %s1641_s19, 512  ;;  %s1280_s22 = scalar_lea.hbm %s1694_s4, 1024 }
 0x197   : > { %p1277_p8 = scmp.ne.s32.totalorder %s1641_s19, %s1276_s10  ;;  %p1281_p10 = scmp.lt.u32.totalorder %s1641_s19, %s1694_s4 }
 0x198   : > { %p1282_p13 = scmp.lt.u32.totalorder %s1280_s22, %s1276_s10  ;;  %p1284_p12 = scmp.lt.u32.totalorder %s1276_s10, %s1641_s19 }
 0x199   : > { %p1278_p11 = pnand %p1277_p8, %p1717_p0 }
 0x19a   : > { %p1283_p3 = por %p1282_p13, %p1281_p10 }
 0x19b   : > { %p1279_p6 = pneg %p1278_p11 }
 0x19c   : > { %p1285_p5 = por %p1284_p12, %p1283_p3 }
 0x19e   : > { %p1286_p9 = pnand %p1285_p5, %p1279_p6 }
 0x1a0   : > { %1289 = shalt.err (!%p1286_p9)
}
 0x1a1   : > { %1099 = dma.vmem_to_hbm [thread:$0]  (%p1717_p0), %s1643_s27, 512, %s1641_s19, %s635_s18  }
 0x1a2 PF: > { %s663_s21 = sand.u32 1, %s1332_s15   ;;  %p1718_p1 = scmp.ne.s32.totalorder %s1704_s24, 0 }
 0x1a3   : > { %p1719_p2 = scmp.ge.s32.totalorder %s1352_s20, 2  ;;  %s664_s23 = scalar_lea.sflag [#allocation4], %s663_s21 }
 0x1a5   : > { %p1113_p7 = pnand %p1719_p2, %p1718_p1 }
 0x1a7   : > { %1327 = dma.done.wait (!%p1113_p7), %s664_s23, 512  }
 0x1a8   : > { %1329 = vsyncadd (!%p1113_p7), %s664_s23, 4294966784  ;;  %s23_s20 = sadd.s32 1, %s1352_s20   ;;  %s1720_s18 = sld [smem:[#allocation13_spill]] }
 0x1a9   : > { %p20_p4 = scmp.ge.s32.totalorder %s23_s20, 4   ;;  %s1721_s19 = sld [smem:[#allocation14_spill]] }
 0x1aa   : > { %s1722_s15 = smov %s1336_s16  ;;  %s1723_s16 = smov %s1340_s17 }
 0x1ab   : > { %s1724_s17 = smov %s1491_s7  ;;  %22 = sbr.rel (!%p20_p4) target bundleno = 10 (0xa), region = 98 }
 0x1b2   :  { %669 = vsyncpa [#allocation3], 1 }
 0x1b3   :  { %671 = vsyncpa [#allocation3 + $0x1], 1 }
 0x1b4   :  { %672 = vsyncpa [#allocation6], 1 }
 0x1b5   :  { %674 = vsyncpa [#allocation6 + $0x1], 1 }
 0x1b6   :  { %675 = vsyncpa [#allocation4], 1 }
 0x1b7   :  { %677 = vsyncpa [#allocation4 + $0x1], 1 }

</bundles_post_ra>
